<compile_context>
chip_gen: v7x
topology: tpu7x:2x2x1
jax: 0.10.0
libtpu: 0.0.40
codegen_flags: <defaults>
</compile_context>

<pallas_src>
import math
import functools

import jax
import jax.numpy as jnp
from jax.experimental import pallas as pl
from jax.experimental.pallas import tpu as pltpu


# ---------------------------------------------------------------------------
# Pallas kernel: one (TS, D) tile of one batch row.
# ---------------------------------------------------------------------------
def _pe_kernel(seed_ref, x_ref, pe_ref, o_ref, *, apply_dropout, drop_threshold,
               keep_scale):
    """seed_ref: SMEM (1,) i32; x_ref/pe_ref/o_ref: VMEM (TS, D) in x.dtype."""
    y = x_ref[...] + pe_ref[...]              # stays in x.dtype (no f32 upcast)

    if apply_dropout:
        ts, d = y.shape
        s_idx = pl.program_id(0)              # seq-tile index
        b_idx = pl.program_id(1)              # batch index (fastest-varying)

        # Tiling-invariant counter-based PRNG: hash(seed, batch, global row, col).
        # Portable: lowers both under Mosaic and in interpret mode, unlike
        # pltpu.prng_seed / prng_random_bits (no CPU lowering).
        seed_u = seed_ref[0].astype(jnp.uint32)
        key = seed_u ^ (b_idx.astype(jnp.uint32) * jnp.uint32(0x9E3779B9))
        row = (jax.lax.broadcasted_iota(jnp.int32, (ts, d), 0)
               + s_idx * ts).astype(jnp.uint32)
        col = jax.lax.broadcasted_iota(jnp.int32, (ts, d), 1).astype(jnp.uint32)
        v = (row * jnp.uint32(0x85EBCA6B)) ^ (col * jnp.uint32(0xC2B2AE35)) ^ key
        # lowbias32 finalizer
        v = v ^ (v >> jnp.uint32(16))
        v = v * jnp.uint32(0x7FEB352D)
        v = v ^ (v >> jnp.uint32(15))
        v = v * jnp.uint32(0x846CA68B)
        v = v ^ (v >> jnp.uint32(16))

        # Integer-domain compare (no >>8 / uint->float convert / 1/2^24 mul):
        # drop with probability p, keep otherwise and scale by 1/(1-p).
        keep = v >= jnp.uint32(drop_threshold)
        scale_c = jnp.asarray(keep_scale, dtype=y.dtype)
        zero_c = jnp.asarray(0, dtype=y.dtype)
        y = y * jnp.where(keep, scale_c, zero_c)

    o_ref[...] = y


def _pick_seq_tile(seq_len):
    # Largest seq tile <= 512 that divides S: 512-row tiles hit ~85% of HBM
    # roofline, and the double-buffered working set stays small enough for
    # v7x's 64 MiB VMEM / v5e's 16 MiB default scoped VMEM at typical d_model.
    for ts in (512, 256, 128, 64, 32, 16, 8):
        if seq_len % ts == 0:
            return ts
    return seq_len        # odd seq lengths: single block along seq (small-model fallback)


# ---------------------------------------------------------------------------
# Module-equivalent wrapper
# ---------------------------------------------------------------------------
class PositionalEncoding:
    """JAX/Pallas port of the PyTorch sinusoidal PositionalEncoding module."""

    def __init__(self, d_model, max_len=5000, dropout=0.1):
        self.d_model = d_model
        self.max_len = max_len
        self.p = float(dropout)

        # Build the sinusoidal table exactly like the PyTorch __init__ (f32).
        position = jnp.arange(0, max_len, dtype=jnp.float32)[:, None]          # (max_len, 1)
        div_term = jnp.exp(
            jnp.arange(0, d_model, 2, dtype=jnp.float32) * (-math.log(10000.0) / d_model)
        )
        angles = position * div_term                                            # (max_len, D/2)
        pe = jnp.zeros((max_len, d_model), dtype=jnp.float32)
        pe = pe.at[:, 0::2].set(jnp.sin(angles))
        pe = pe.at[:, 1::2].set(jnp.cos(angles)[:, : d_model // 2])
        self.pe = pe[None, :, :]        # (1, max_len, D) f32 — mirrors the torch buffer
        self._pe_2d = pe                # (max_len, D) table handed to the kernel
        self._pe_cache = {}             # per-activation-dtype copies (avoid f32 DMA for bf16 x)

    def _pe_for(self, dtype):
        dt = jnp.dtype(dtype)
        if dt not in self._pe_cache:
            self._pe_cache[dt] = self._pe_2d.astype(dt)
        return self._pe_cache[dt]

    def __call__(self, x, *, training=False, seed=0):
        B, S, D = x.shape
        assert D == self.d_model and S <= self.max_len
        # NOTE: real transformer d_model (512/768/1024) is lane-dense (multiple of
        # 128); the toy D=32 below equals the full array dim, which is also legal.

        ts = _pick_seq_tile(S)
        num_s = pl.cdiv(S, ts)

        pe = self._pe_for(x.dtype)                 # full (max_len, D) table; BlockSpec selects rows
        seed_arr = jnp.array([seed], dtype=jnp.int32)

        apply_dropout = bool(training) and self.p > 0.0
        drop_threshold = min(int(round(self.p * 2.0 ** 32)), 2 ** 32 - 1)
        keep_scale = 1.0 / (1.0 - self.p) if self.p < 1.0 else 0.0

        kernel = functools.partial(
            _pe_kernel,
            apply_dropout=apply_dropout,
            drop_threshold=drop_threshold,
            keep_scale=keep_scale,
        )

        return pl.pallas_call(
            kernel,
            out_shape=jax.ShapeDtypeStruct((B, S, D), x.dtype),
            # Batch is the fastest grid axis; pe's index_map ignores it, so the
            # same pe tile is kept resident (not re-fetched) for B consecutive steps.
            grid=(num_s, B),
            in_specs=[
                pl.BlockSpec(memory_space=pltpu.SMEM),                    # seed (1,) scalar
                pl.BlockSpec((None, ts, D), lambda s, b: (b, s, 0)),      # x tile (batch squeezed)
                pl.BlockSpec((ts, D), lambda s, b: (s, 0)),               # pe tile (batch-independent)
            ],
            out_specs=pl.BlockSpec((None, ts, D), lambda s, b: (b, s, 0)),
            compiler_params=pltpu.CompilerParams(
                dimension_semantics=("parallel", "parallel"),
            ),
            # TODO(synk): under jit with donated x, add input_output_aliases={1: 0}
            # to drop the extra B*S*D output allocation.
        )(seed_arr, x, pe)


# ---------------------------------------------------------------------------
# Self-check
# ---------------------------------------------------------------------------
if __name__ == "__main__":
    key = jax.random.PRNGKey(0)
    B, S, D = 2, 8, 32
    x = jax.random.normal(key, (B, S, D), dtype=jnp.float32)

    module = PositionalEncoding(d_model=D, max_len=64, dropout=0.1)

    # Eval mode: dropout is identity (nn.Dropout.eval() semantics).
    y = jax.block_until_ready(module(x, training=False))
    y_ref = x + module.pe[:, :S, :]
    assert y.shape == (B, S, D)
    assert jnp.allclose(y, y_ref, atol=1e-6, rtol=1e-6), "eval-mode mismatch vs reference"

    # Training mode: inverted dropout — every output is 0 or (x + pe) / (1 - p).
    y_tr = jax.block_until_ready(module(x, training=True, seed=1234))
    assert y_tr.shape == (B, S, D)
    scale = 1.0 / (1.0 - module.p)
    ok = (y_tr == 0) | jnp.isclose(y_tr, y_ref * scale, atol=1e-5, rtol=1e-5)
    assert bool(jnp.all(ok)), "training-mode values are not in {0, (x+pe)/(1-p)}"
    dropped = float(jnp.mean((y_tr == 0).astype(jnp.float32)))
    assert 0.0 < dropped < 0.6, "dropout mask looks degenerate"

    print("KERNEL_OK")
</pallas_src>

<mosaic_0001>
module attributes {stable_mosaic.version = 11 : i64} {
  func.func @_pe_kernel(%arg0: i32, %arg1: i32, %arg2: memref<1xi32, #tpu.memory_space<smem>>, %arg3: memref<1x8x32xf32, #tpu.memory_space<vmem>>, %arg4: memref<8x32xf32, #tpu.memory_space<vmem>>, %arg5: memref<1x8x32xf32, #tpu.memory_space<vmem>>) attributes {dimension_semantics = [#tpu.dimension_semantics<parallel>, #tpu.dimension_semantics<parallel>], iteration_bounds = array<i64: 1, 2>, scalar_prefetch = 0 : i64, scratch_operands = 0 : i64, tpu.core_type = #tpu.core_type<tc>, window_params = [{transform_indices = @transform_0, window_bounds = array<i64: 1>}, {transform_indices = @transform_1, window_bounds = array<i64: 1, 8, 32>}, {transform_indices = @transform_2, window_bounds = array<i64: 8, 32>}, {transform_indices = @transform_3, window_bounds = array<i64: 1, 8, 32>}]} {
    %c0 = arith.constant 0 : index
    %c0_0 = arith.constant 0 : index
    %c0_1 = arith.constant 0 : index
    %0 = vector.load %arg3[%c0, %c0_0, %c0_1] : memref<1x8x32xf32, #tpu.memory_space<vmem>>, vector<1x8x32xf32>
    %1 = vector.shape_cast %0 : vector<1x8x32xf32> to vector<8x32xf32>
    %c0_2 = arith.constant 0 : index
    %c0_3 = arith.constant 0 : index
    %2 = vector.load %arg4[%c0_2, %c0_3] : memref<8x32xf32, #tpu.memory_space<vmem>>, vector<8x32xf32>
    %3 = arith.addf %1, %2 : vector<8x32xf32>
    %c0_4 = arith.constant 0 : index
    %c0_5 = arith.constant 0 : index
    %c0_6 = arith.constant 0 : index
    %4 = vector.load %arg5[%c0_4, %c0_5, %c0_6] : memref<1x8x32xf32, #tpu.memory_space<vmem>>, vector<1x8x32xf32>
    %5 = vector.shape_cast %4 : vector<1x8x32xf32> to vector<8x32xf32>
    %6 = vector.shape_cast %3 : vector<8x32xf32> to vector<1x8x32xf32>
    tpu.vector_store %arg5[%c0_4, %c0_5, %c0_6], %6 {strides = array<i32>} : memref<1x8x32xf32, #tpu.memory_space<vmem>>, vector<1x8x32xf32>,
    return
  }
  func.func @transform_0(%arg0: i32, %arg1: i32) -> i32 {
    %c0_i32 = arith.constant 0 : i32
    %c0_i32_0 = arith.constant 0 : i32
    return %c0_i32 : i32
  }
  func.func @transform_1(%arg0: i32, %arg1: i32) -> (i32, i32, i32) {
    %c0_i32 = arith.constant 0 : i32
    %c0_i32_0 = arith.constant 0 : i32
    return %arg1, %arg0, %c0_i32 : i32, i32, i32
  }
  func.func @transform_2(%arg0: i32, %arg1: i32) -> (i32, i32) {
    %c0_i32 = arith.constant 0 : i32
    %c0_i32_0 = arith.constant 0 : i32
    return %arg0, %c0_i32 : i32, i32
  }
  func.func @transform_3(%arg0: i32, %arg1: i32) -> (i32, i32, i32) {
    %c0_i32 = arith.constant 0 : i32
    %c0_i32_0 = arith.constant 0 : i32
    return %arg1, %arg0, %c0_i32 : i32, i32, i32
  }
}

</mosaic_0001>

<bundles_post_ra>
// kernel: tpu_custom_call.1
= control target key start
LH: loop header
LB: loop body
LE: loop exit
PB: predicated region body
PF: predicated region fallthrough
CT: control target
= control target key end

     0   :  { %9 = vsyncpa [#allocation4], 0  ;;  %s598_s0 = inlined_call_operand.<no memory space> [shape: s32[1], index: 0, kind: input, shape index: {}]   ;;  %s599_s1 = inlined_call_operand.vmem [shape: f32[2,8,32], index: 1, kind: input, shape index: {}]   ;;  %s600_s2 = inlined_call_operand.vmem [shape: f32[64,32], index: 2, kind: input, shape index: {}]   ;;  %s601_s3 = inlined_call_operand.hbm [shape: f32[2,8,32], index: 3, kind: output, shape index: {}]  }
   0x1   :  { %11 = vsyncpa [#allocation4 + $0x1], 0  ;;  %s483_s12 = smov 0   ;;  %s485_s13 = smov 0  }
   0x2   :  { %s487_s14 = smov 0   ;;  %s489_s15 = smov 0  }
   0x3   :  { %s491_s0 = smov 0   ;;  %s493_s16 = smov 0  }
   0x4 LB: > { %s315_s17 = sadd.s32 4294967295, %s460_s16   ;;  %s316_s18 = sadd.s32 4294967294, %s460_s16   ;;  %s460_s16 = sphi %s493_s16, %s17_s16   ;;  %s456_s0 = sphi %s491_s0, %s608_s0   ;;  %s452_s15 = sphi %s489_s15, %s607_s15   ;;  %s448_s14 = sphi %s487_s14, %s606_s14   ;;  %s444_s13 = sphi %s485_s13, %s605_s13   ;;  %s440_s12 = sphi %s483_s12, %s604_s12  }
   0x5   : > { %s26_s19 = sadd.s32 1, %s456_s0  ;;  %s113_s20 = sadd.s32 1, %s448_s14 }
   0x6   : > { %p27_p0 = scmp.ge.s32.totalorder %s26_s19, 2  ;;  %p123_p1 = scmp.ne.s32.totalorder %s448_s14, %s444_s13 }
   0x7   : > { %p124_p2 = scmp.eq.s32.totalorder %s315_s17, 1  ;;  %p129_p3 = scmp.ne.s32.totalorder %s444_s13, %s440_s12 }
   0x8   : > { %s610_s19 = smov (%p27_p0, %s26_s19), 0  ;;  %p130_p5 = scmp.eq.s32.totalorder %s316_s18, 1 }
   0x9   : > { %p523_p4 = por %p124_p2, %p123_p1  ;;  %s108_s22 = ssub.s32 %s456_s0, %s610_s19 }
   0xa   : > { %p320_p6 = scmp.ge.s32.totalorder %s460_s16, 1  ;;  %p111_p7 = scmp.eq.s32.totalorder %s108_s22, 0 }
   0xb   : > { %p530_p8 = por %p130_p5, %p129_p3  ;;  %p168_p9 = scmp.lt.s32.totalorder %s460_s16, 3 }
   0xc   : > { %s536_s24 = scalar_select %p111_p7, %s448_s14, %s113_s20  }
   0xd   : > { %p169_p10 = pnand %p320_p6, %p168_p9 }
   0xe   : > { %s195_s25 = sand.u32 (!%p169_p10), 1, %s444_s13   ;;  %p198_p11 = scmp.lt.s32.totalorder (!%p169_p10), %s452_s15, 1  ;;  %v210_v0 = vld [vmem:[%s600_s2] sm:$0xff] (!%p169_p10)  ;;  %vm212_vm0 = vcmask (!%p169_p10), 261120  }
   0xf   : > { %172 = sbr.rel (%p169_p10) target bundleno = 43 (0x2b), region = 32  ;;  %s321_s26 = sshll.u32 (!%p169_p10), %s195_s25, 3 }
  0x10   : > { %s324_s28 = sshll.u32 (!%p169_p10), %s452_s15, 7  ;;  %s197_s5 = scalar_lea.vmem (!%p169_p10), [#allocation3], %s321_s26 }
  0x11   : > { %s229_s6 = sshll.u32 (!%p169_p10), %s197_s5, 4  ;;  %s215_s17 = scalar_lea.sflag (!%p169_p10), [#allocation4], %s195_s25  ;;  %s548_s6 = int_to_ptr.vmem [resolvable:$true] %s229_s6 }
  0x12   : > { %s382_s18 = scalar_lea.vmem (!%p169_p10), %s548_s6, 128  ;;  %s462_s20 = smov (!%p169_p10), [#allocation3]  }
  0x13   : > { %p383_p12 = scmp.ne.s32.totalorder (!%p169_p10), %s548_s6, %s382_s18  ;;  %s386_s22 = sshll.u32 (!%p169_p10), %s462_s20, 4  ;;  %s387_s22 = int_to_ptr.vmem [resolvable:$false] %s386_s22 }
  0x14   : > { %s388_s26 = scalar_lea.vmem (!%p169_p10), %s387_s22, 256  ;;  %p389_p1 = scmp.lt.s32.totalorder (!%p169_p10), %s548_s6, %s387_s22 }
  0x15   : > { %p384_p13 = pnand (!%p169_p10), %p383_p12, %p523_p4  ;;  %p390_p2 = scmp.lt.s32.totalorder (!%p169_p10), %s388_s26, %s382_s18 }
  0x16   : > { %s199_s27 = scalar_select %p198_p11, %s452_s15, 1 }
  0x17   : > { %s553_s15 = scalar_lea.hbm %s601_s3, %s324_s28  ;;  %p385_p0 = pneg %p384_p13 }
  0x18   : > { %s322_s29 = sshll.u32 %s199_s27, 3  ;;  %p391_p3 = por %p390_p2, %p389_p1 }
  0x19   : > { %s204_s9 = scalar_lea.vmem %s599_s1, %s322_s29 }
  0x1a   : > { %v209_v1 = vld [vmem:[%s204_s9] sm:$0xff]  ;;  %p392_p5 = pnand %p391_p3, %p385_p0 }
  0x1b   : > { %v211_v2 = vadd.f32 %v210_v0, %v209_v1 }
  0x1d   : > { %213 = vst.msk [vmem:[%s197_s5] sm:$0xff] %vm212_vm0, %v211_v2 }
  0x1e   : > { %395 = shalt.err (!%p392_p5)
}
  0x1f   : > { %s396_s25 = scalar_lea.hbm %s553_s15, 128  ;;  %s400_s29 = scalar_lea.hbm %s601_s3, 256 }
  0x20   : > { %p397_p6 = scmp.ne.s32.totalorder %s553_s15, %s396_s25  ;;  %p401_p10 = scmp.lt.u32.totalorder %s553_s15, %s601_s3 }
  0x21   : > { %p402_p11 = scmp.lt.u32.totalorder %s400_s29, %s396_s25  ;;  %p404_p13 = scmp.lt.u32.totalorder %s396_s25, %s553_s15 }
  0x22   : > { %p398_p7 = pnand %p397_p6, %p523_p4 }
  0x23   : > { %p403_p12 = por %p402_p11, %p401_p10 }
  0x24   : > { %p399_p9 = pneg %p398_p7 }
  0x25   : > { %p405_p0 = por %p404_p13, %p403_p12 }
  0x27   : > { %p406_p1 = pnand %p405_p0, %p399_p9 }
  0x29   : > { %409 = shalt.err (!%p406_p1)
}
  0x2a   : > { %327 = dma.vmem_to_hbm [thread:$0]  (%p523_p4), %s548_s6, 128, %s553_s15, %s215_s17  }
  0x2b PF: > { %p333_p2 = scmp.ge.s32.totalorder %s460_s16, 2  ;;  %s241_s5 = sand.u32 1, %s440_s12  }
  0x2c   : > { %s242_s7 = scalar_lea.sflag [#allocation4], %s241_s5 }
  0x2d   : > { %p330_p3 = pnand %p333_p2, %p530_p8 }
  0x2f   : > { %435 = dma.done.wait (!%p330_p3), %s242_s7, 128  }
  0x30   : > { %437 = vsyncadd (!%p330_p3), %s242_s7, 4294967168  ;;  %s17_s16 = sadd.s32 1, %s460_s16   ;;  %s604_s12 = smov %s444_s13 }
  0x31   : > { %p14_p5 = scmp.ge.s32.totalorder %s17_s16, 4   ;;  %s605_s13 = smov %s448_s14 }
  0x32   : > { %s606_s14 = smov %s536_s24  ;;  %s607_s15 = smov %s456_s0 }
  0x33   : > { %s608_s0 = smov %s610_s19  ;;  %16 = sbr.rel (!%p14_p5) target bundleno = 4 (0x4), region = 70 }
  0x3a   :  { %247 = vsyncpa [#allocation4], 1 }
  0x3b   :  { %249 = vsyncpa [#allocation4 + $0x1], 1 }

</bundles_post_ra>
